<compile_context>
chip_gen: v7x
topology: tpu7x:2x2x1
jax: 0.10.0
libtpu: 0.0.40
codegen_flags: <defaults>
</compile_context>

<pallas_src>
import jax
import jax.numpy as jnp
from jax.experimental import pallas as pl
from jax.experimental.pallas import tpu as pltpu


def _round_up(x, m):
    return ((x + m - 1) // m) * m


def _cdiv(a, b):
    return (a + b - 1) // b


def _qnet_kernel(x_ref, w_ref, fused_ref, o_ref):
    # x_ref: [TILE_B, D] (any float dtype), w_ref: [D, GA_pad] (bf16, resident),
    # fused_ref: [1, GA] f32 (resident), o_ref: [TILE_B, GA] f32.
    x = x_ref[...].astype(w_ref.dtype)               # cast in VMEM, not in HBM
    y = jnp.dot(x, w_ref[...], preferred_element_type=jnp.float32)
    ga = o_ref.shape[-1]
    o_ref[...] = y[:, :ga] + fused_ref[...]          # narrow (unpadded) store


def prepare_many_gamma_params(w, b, gammas, num_actions, *,
                              neural_net_multiplier=1.0,
                              additive_constant=0.0,
                              additive_multiple_of_vmax=0.0,
                              r_max=1.0,
                              param_dtype=jnp.bfloat16):
    """One-time parameter folding (hoist out of the per-forward path).

    w: [D, G*A] float32 (Linear weight pre-transposed), b: [G*A] float32.
    Returns (w_prepped [D, GA_pad] param_dtype, fused [1, GA] float32).
    """
    gammas = jnp.asarray(gammas, jnp.float32)
    G = int(gammas.shape[0])
    A = int(num_actions)
    GA = G * A
    D = w.shape[0]
    assert w.shape == (D, GA)
    assert b.shape == (GA,)

    m = jnp.asarray(neural_net_multiplier, jnp.float32)
    # NOTE: gamma == 1.0 gives vmax = inf (identical to the PyTorch reference);
    # it poisons the fused bias if additive_multiple_of_vmax != 0.
    maximum_value = r_max / (1.0 - gammas)                                # [G]
    add_vec = (jnp.asarray(additive_constant, jnp.float32)
               + jnp.asarray(additive_multiple_of_vmax, jnp.float32)
               * maximum_value)                                           # [G]
    add_flat = jnp.repeat(add_vec, A)                                     # [GA]
    fused = (b.astype(jnp.float32) * m + add_flat).reshape(1, GA)         # f32
    w_scaled = w.astype(jnp.float32) * m                                  # [D, GA]

    # Lane-dense MXU operand only: pad GA to a multiple of 128 in VMEM.  The
    # HBM output stays GA wide (no padded writeback).
    GA_pad = _round_up(GA, 128)
    w_prepped = jnp.pad(w_scaled, ((0, 0), (0, GA_pad - GA))).astype(param_dtype)
    return w_prepped, fused


def many_gamma_q_forward_prepared(x, w_prepped, fused, num_gammas, num_actions, *,
                                  tile_b=1024, min_grid_steps=1,
                                  min_pallas_batch=256):
    """x: [B, D]; w_prepped/fused from prepare_many_gamma_params.
    Returns [B, G, A] float32 matching ManyGammaQNetwork.forward."""
    B, D = x.shape
    G, A = int(num_gammas), int(num_actions)
    GA = G * A
    GA_pad = w_prepped.shape[1]
    assert w_prepped.shape[0] == D
    assert fused.shape == (1, GA)

    if B < min_pallas_batch:
        # Small-batch fallback: XLA's fused dot already wins at this scale.
        y = jnp.dot(x.astype(w_prepped.dtype), w_prepped,
                    preferred_element_type=jnp.float32)[:, :GA] + fused
        return y.reshape(B, G, A)

    # Balanced batch tiling: ~tile_b rows/tile, >= min_grid_steps tiles,
    # at most 7 rows of padding in total.
    n_tiles = max(int(min_grid_steps), _cdiv(B, int(tile_b)))
    TILE_B = _round_up(_cdiv(B, n_tiles), 8)
    B_pad = n_tiles * TILE_B
    x_p = x if B_pad == B else jnp.pad(x, ((0, B_pad - B), (0, 0)))

    cost = pl.CostEstimate(
        flops=2 * B_pad * D * GA_pad,
        transcendentals=0,
        bytes_accessed=(B_pad * D * x.dtype.itemsize            # x read
                        + D * GA_pad * w_prepped.dtype.itemsize  # W read (once)
                        + GA * 4                                 # fused read
                        + B_pad * GA * 4),                       # output write
    )

    out = pl.pallas_call(
        _qnet_kernel,
        out_shape=jax.ShapeDtypeStruct((B_pad, GA), jnp.float32),
        grid=(n_tiles,),
        in_specs=[
            pl.BlockSpec((TILE_B, D), lambda i: (i, 0)),     # x tile (strides)
            pl.BlockSpec((D, GA_pad), lambda i: (0, 0)),     # W (VMEM resident)
            pl.BlockSpec((1, GA), lambda i: (0, 0)),         # fused bias (resident)
        ],
        out_specs=pl.BlockSpec((TILE_B, GA), lambda i: (i, 0)),
        compiler_params=pltpu.CompilerParams(
            dimension_semantics=("parallel",)),
        cost_estimate=cost,
    )(x_p, w_prepped, fused)

    out = out if B_pad == B else out[:B]
    return out.reshape(B, G, A)


def many_gamma_q_forward(x, w, b, gammas, num_actions, **kwargs):
    """Convenience wrapper (prepare + forward).  Prefer calling
    prepare_many_gamma_params once and many_gamma_q_forward_prepared per step."""
    fwd_kwargs = {k: kwargs.pop(k)
                  for k in ("tile_b", "min_grid_steps", "min_pallas_batch")
                  if k in kwargs}
    w_prepped, fused = prepare_many_gamma_params(w, b, gammas, num_actions, **kwargs)
    G = int(jnp.asarray(gammas).shape[0])
    return many_gamma_q_forward_prepared(x, w_prepped, fused, G, num_actions,
                                         **fwd_kwargs)


if __name__ == "__main__":
    # Small, deterministic problem sizes consistent with the module:
    #   batch B=8, obs_dim D=32, num_gammas G=4, num_actions A=4.
    B, D, G, A = 8, 32, 4, 4

    key = jax.random.PRNGKey(0)
    kx, kw, kb, kx2 = jax.random.split(key, 4)

    x = jax.random.normal(kx, (B, D), dtype=jnp.float32)
    # Deterministic "Linear" parameters (stored pre-transposed: [D, G*A]).
    w = jax.random.normal(kw, (D, G * A), dtype=jnp.float32) * 0.1
    b = jax.random.normal(kb, (G * A,), dtype=jnp.float32) * 0.1
    gammas = jnp.array([0.9, 0.95, 0.99, 0.995], dtype=jnp.float32)

    neural_net_multiplier = 2.0
    additive_constant = 0.1
    additive_multiple_of_vmax = 0.05
    r_max = 1.0

    # One-time parameter preparation (hoisted out of the forward path).
    w_prepped, fused = prepare_many_gamma_params(
        w, b, gammas, A,
        neural_net_multiplier=neural_net_multiplier,
        additive_constant=additive_constant,
        additive_multiple_of_vmax=additive_multiple_of_vmax,
        r_max=r_max)

    def reference(xv):
        vmax = r_max / (1.0 - gammas)
        ref = (xv @ w + b).reshape(xv.shape[0], G, A) * neural_net_multiplier
        ref = ref + additive_constant
        ref = ref + additive_multiple_of_vmax * vmax[None, :, None]
        return ref

    # 1) Small-shape run, forcing the Pallas path (fallback disabled).
    out = many_gamma_q_forward_prepared(x, w_prepped, fused, G, A,
                                        min_pallas_batch=0)
    out = jax.block_until_ready(out)
    assert out.shape == (B, G, A)
    # bf16 matmul operands -> loosened tolerance vs the pure-f32 reference.
    assert jnp.allclose(out, reference(x), atol=5e-2, rtol=5e-2)

    # 2) Larger, non-multiple-of-8 batch exercising the balanced multi-tile
    #    pipeline and the padded last tile (min_grid_steps=2 as on v7x).
    B2 = 520
    x2 = jax.random.normal(kx2, (B2, D), dtype=jnp.float32)
    out2 = jax.block_until_ready(
        many_gamma_q_forward_prepared(x2, w_prepped, fused, G, A,
                                      tile_b=256, min_grid_steps=2))
    assert out2.shape == (B2, G, A)
    assert jnp.allclose(out2, reference(x2), atol=5e-2, rtol=5e-2)

    print("KERNEL_OK")
</pallas_src>

<mosaic_0001>
module attributes {stable_mosaic.version = 11 : i64} {
  func.func @_qnet_kernel(%arg0: i32, %arg1: memref<8x32xf32, #tpu.memory_space<vmem>>, %arg2: memref<32x128xbf16, #tpu.memory_space<vmem>>, %arg3: memref<1x16xf32, #tpu.memory_space<vmem>>, %arg4: memref<8x16xf32, #tpu.memory_space<vmem>>) attributes {dimension_semantics = [#tpu.dimension_semantics<parallel>], iteration_bounds = array<i64: 1>, scalar_prefetch = 0 : i64, scratch_operands = 0 : i64, tpu.core_type = #tpu.core_type<tc>, window_params = [{transform_indices = @transform_0, window_bounds = array<i64: 8, 32>}, {pipeline_mode = #tpu.pipeline_mode<synchronous>, transform_indices = @transform_1, window_bounds = array<i64: 32, 128>}, {pipeline_mode = #tpu.pipeline_mode<synchronous>, transform_indices = @transform_2, window_bounds = array<i64: 1, 16>}, {transform_indices = @transform_3, window_bounds = array<i64: 8, 16>}]} {
    %c0 = arith.constant 0 : index
    %c0_0 = arith.constant 0 : index
    %0 = vector.load %arg1[%c0, %c0_0] : memref<8x32xf32, #tpu.memory_space<vmem>>, vector<8x32xf32>
    %1 = arith.truncf %0 : vector<8x32xf32> to vector<8x32xbf16>
    %c0_1 = arith.constant 0 : index
    %c0_2 = arith.constant 0 : index
    %2 = vector.load %arg2[%c0_1, %c0_2] : memref<32x128xbf16, #tpu.memory_space<vmem>>, vector<32x128xbf16>
    %cst = arith.constant dense<0.000000e+00> : vector<8x128xf32>
    %3 = tpu.matmul %1, %2, %cst {dimension_numbers = #tpu.dot_dimension_numbers<[1], [0], [0], [1], [0, 0, 1, 1], [], []>} : vector<8x32xbf16>, vector<32x128xbf16>, vector<8x128xf32> -> vector<8x128xf32>
    %4 = vector.extract_strided_slice %3 {offsets = [0, 0], sizes = [8, 16], strides = [1, 1]} : vector<8x128xf32> to vector<8x16xf32>
    %c0_3 = arith.constant 0 : index
    %c0_4 = arith.constant 0 : index
    %5 = vector.load %arg3[%c0_3, %c0_4] : memref<1x16xf32, #tpu.memory_space<vmem>>, vector<1x16xf32>
    %6 = vector.broadcast %5 : vector<1x16xf32> to vector<8x16xf32>
    %7 = arith.addf %4, %6 : vector<8x16xf32>
    %c0_5 = arith.constant 0 : index
    %c0_6 = arith.constant 0 : index
    %8 = vector.load %arg4[%c0_5, %c0_6] : memref<8x16xf32, #tpu.memory_space<vmem>>, vector<8x16xf32>
    tpu.vector_store %arg4[%c0_5, %c0_6], %7 {strides = array<i32>} : memref<8x16xf32, #tpu.memory_space<vmem>>, vector<8x16xf32>,
    return
  }
  func.func @transform_0(%arg0: i32) -> (i32, i32) {
    %c0_i32 = arith.constant 0 : i32
    %c0_i32_0 = arith.constant 0 : i32
    return %arg0, %c0_i32 : i32, i32
  }
  func.func @transform_1(%arg0: i32) -> (i32, i32) {
    %c0_i32 = arith.constant 0 : i32
    %c0_i32_0 = arith.constant 0 : i32
    %c0_i32_1 = arith.constant 0 : i32
    return %c0_i32, %c0_i32_0 : i32, i32
  }
  func.func @transform_2(%arg0: i32) -> (i32, i32) {
    %c0_i32 = arith.constant 0 : i32
    %c0_i32_0 = arith.constant 0 : i32
    %c0_i32_1 = arith.constant 0 : i32
    return %c0_i32, %c0_i32_0 : i32, i32
  }
  func.func @transform_3(%arg0: i32) -> (i32, i32) {
    %c0_i32 = arith.constant 0 : i32
    %c0_i32_0 = arith.constant 0 : i32
    return %arg0, %c0_i32 : i32, i32
  }
}

</mosaic_0001>

<bundles_post_ra>
// kernel: tpu_custom_call.1
= control target key start
LH: loop header
LB: loop body
LE: loop exit
PB: predicated region body
PF: predicated region fallthrough
CT: control target
= control target key end

     0   :  { %8 = vsyncpa [#allocation3], 0  ;;  %s299_s0 = inlined_call_operand.hbm [shape: f32[8,32], index: 0, kind: input, shape index: {}]   ;;  %s300_s1 = inlined_call_operand.hbm [shape: bf16[32,128], index: 1, kind: input, shape index: {}]   ;;  %s301_s2 = inlined_call_operand.vmem [shape: f32[1,16], index: 2, kind: input, shape index: {}]   ;;  %s302_s3 = inlined_call_operand.hbm [shape: f32[8,16], index: 3, kind: output, shape index: {}]  }
   0x1   :  { %9 = vsyncpa [#allocation6], 0 }
   0x2   :  { %10 = vsyncpa [#allocation4], 0  ;;  %s226_s12 = smov [#allocation2]   ;;  %s227_s14 = smov [#allocation5]  }
   0x3   :  { %s17_s13 = sshll.u32 %s226_s12, 4  ;;  %s26_s15 = sshll.u32 %s227_s14, 4  ;;  %s18_s13 = int_to_ptr.vmem [resolvable:$true] %s17_s13  ;;  %s253_s15 = int_to_ptr.vmem [resolvable:$true] %s26_s15 }
   0x4   :  { %s154_s18 = scalar_lea.hbm %s299_s0, 128 }
   0x5   :  { %p155_p0 = scmp.ne.s32.totalorder %s299_s0, %s154_s18  ;;  %p158_p1 = scmp.lt.u32.totalorder %s154_s18, %s299_s0 }
   0x7   :  { %p160_p2 = pnand %p158_p1, %p155_p0 }
   0x9   :  { %163 = shalt.err (!%p160_p2)
}
   0xa   :  { %s164_s23 = scalar_lea.vmem %s18_s13, 128  ;;  %p169_p4 = scmp.lt.s32.totalorder %s18_s13, %s18_s13 }
   0xb   :  { %p165_p3 = scmp.ne.s32.totalorder %s18_s13, %s164_s23  ;;  %p170_p5 = scmp.lt.s32.totalorder %s164_s23, %s164_s23 }
   0xd   :  { %p171_p6 = por %p170_p5, %p169_p4 }
   0xf   :  { %p172_p7 = pnand %p171_p6, %p165_p3 }
  0x11   :  { %175 = shalt.err (!%p172_p7)
}
  0x12   :  { %20 = dma.hbm_to_vmem [thread:$0]  %s299_s0, 128, %s18_s13, [#allocation3]  }
  0x13   :  { %s176_s28 = scalar_lea.hbm %s300_s1, 256 }
  0x14   :  { %p177_p8 = scmp.ne.s32.totalorder %s300_s1, %s176_s28  ;;  %p180_p9 = scmp.lt.u32.totalorder %s176_s28, %s300_s1 }
  0x16   :  { %p182_p10 = pnand %p180_p9, %p177_p8 }
  0x18   :  { %185 = shalt.err (!%p182_p10)
}
  0x19   :  { %s186_s6 = scalar_lea.vmem %s253_s15, 256  ;;  %p191_p12 = scmp.lt.s32.totalorder %s253_s15, %s253_s15 }
  0x1a   :  { %p187_p11 = scmp.ne.s32.totalorder %s253_s15, %s186_s6  ;;  %p192_p13 = scmp.lt.s32.totalorder %s186_s6, %s186_s6 }
  0x1c   :  { %p193_p0 = por %p192_p13, %p191_p12 }
  0x1e   :  { %p194_p1 = pnand %p193_p0, %p187_p11 }
  0x20   :  { %197 = shalt.err (!%p194_p1)
}
  0x21   :  { %s228_s0 = smov 64   ;;  %s229_s7 = smov 4  }
  0x22   :  { %32 = dma.hbm_to_vmem [thread:$0]  %s300_s1, 256, %s253_s15, [#allocation6], %s228_s0, %s228_s0, %s229_s7  }
  0x23   :  { %220 = dma.done.wait [#allocation3], 128  }
  0x24   :  { %221 = vsyncadd [#allocation3], 4294967168 }
  0x25   :  { %222 = dma.done.wait [#allocation6], 256  }
  0x26   :  { %223 = vsyncadd [#allocation6], 4294967040  ;;  %v230_v0 = vmov 0.0   ;;  %vm231_vm0 = vmmov 0   ;;  %v152_v1 = vld [vmem:[#allocation5] sm:$0xff]   ;;  %v153_v2 = vld [vmem:[#allocation5 + $0x8] sm:$0xff]  }
  0x27   :  { %137 = vmatprep.subr.bf16.mxu0 %v230_v0  ;;  %141 = vmatprep.mubr.msk.bf16.mxu0 %vm231_vm0, %v230_v0  ;;  %v42_v3 = vld [vmem:[#allocation2] sm:$0xff]  ;;  %vm60_vm1 = vcmask 261120   ;;  %s232_s1 = smov [#allocation7]   ;;  %vm112_vm2 = vcmask 130048  }
  0x28   :  { %138 = vmatpush3.bf16.msra.mxu0 %v152_v1  ;;  %v43_v4 = vpack.c.bf16 %v42_v3, %v42_v3  ;;  %v133_v5 = vld [vmem:[%s301_s2] ss:$0 sm:$0xff]  ;;  %s120_s12 = sshll.u32 %s232_s1, 4  ;;  %s121_s12 = int_to_ptr.vmem [resolvable:$true] %s120_s12 }
  0x29   :  { %139 = vmatprep.subr.bf16.mxu0 %v230_v0  ;;  %s198_s13 = scalar_lea.vmem %s121_s12, 128  ;;  %p203_p3 = scmp.lt.s32.totalorder %s121_s12, %s121_s12 }
  0x2a   :  { %p199_p2 = scmp.ne.s32.totalorder %s121_s12, %s198_s13  ;;  %p204_p4 = scmp.lt.s32.totalorder %s198_s13, %s198_s13 }
  0x2c   :  { %140 = vmatpush3.bf16.msra.mxu0 %v153_v2  ;;  %p205_p5 = por %p204_p4, %p203_p3 }
  0x2e   :  { %p206_p6 = pnand %p205_p5, %p199_p2 }
  0x2f   :  { %142 = vmatmul.mubr.msk.bf16.vlgmr.msra.gmra.mrb[0].mxu0 %vm60_vm1, %v43_v4 }
 0x102   :  { %v98_v6 = vpop.f32.mrb[0].mxu0 }
 0x103   :  { %v111_v7 = vadd.f32 %v133_v5, %v98_v6  ;;  %v143_v8 = vpop.f32.mrb[1].mxu0 }
 0x104   :  { %v101_v9 = vpop.f32.mrb[2].mxu0 }
 0x105   :  { %v144_v10 = vpop.f32.mrb[3].mxu0  ;;  %113 = vst.msk [vmem:[#allocation7] sm:$0xff] %vm112_vm2, %v111_v7 }
 0x106   :  { %209 = shalt.err (!%p206_p6)
}
 0x107   :  { %s210_s2 = scalar_lea.hbm %s302_s3, 128 }
 0x108   :  { %p211_p7 = scmp.ne.s32.totalorder %s302_s3, %s210_s2  ;;  %p214_p8 = scmp.lt.u32.totalorder %s210_s2, %s302_s3 }
 0x10a   :  { %p216_p9 = pnand %p214_p8, %p211_p7 }
 0x10c   :  { %219 = shalt.err (!%p216_p9)
}
 0x10d   :  { %123 = dma.vmem_to_hbm [thread:$0]  %s121_s12, 128, %s302_s3, [#allocation4]  }
 0x10e   :  { %224 = dma.done.wait [#allocation4], 128  }
 0x10f   :  { %225 = vsyncadd [#allocation4], 4294967168 }
 0x110   :  { %127 = vsyncpa [#allocation3], 1 }
 0x111   :  { %128 = vsyncpa [#allocation6], 1 }
 0x112   :  { %129 = vsyncpa [#allocation4], 1 }

</bundles_post_ra>
